<compile_context>
chip_gen: v6e
topology: v6e:2x2x1
jax: 0.10.0
libtpu: 0.0.40
codegen_flags: <defaults>
</compile_context>

<pallas_src>
import functools

import jax
import jax.numpy as jnp
from jax.experimental import pallas as pl
from jax.experimental.pallas import tpu as pltpu


def _round_up(x, m):
    return ((x + m - 1) // m) * m


def _vmem_soft_cap():
    """Physical VMEM capacity minus headroom for Mosaic-internal scratch."""
    try:
        cap = int(pltpu.get_tpu_info().vmem_capacity_bytes)
    except Exception:
        cap = 64 * 1024 * 1024      # conservative (v7x per-TensorCore VMEM)
    return (cap * 7) // 8


# ---------------------------------------------------------------------------
# S construction (plain JAX glue, outside the kernel).
# ---------------------------------------------------------------------------
def build_norm_adj(edge_index, num_nodes, dtype=jnp.float32):
    """Dense D^{-1/2}(A+I)D^{-1/2}, matching GCNConv.norm with unit weights.

    edge_index: int array [2, E], row 0 = source (j), row 1 = target (i).
    Assumes the input graph has no self loops (one self loop per node added).
    """
    row = edge_index[0]
    col = edge_index[1]
    loop = jnp.arange(num_nodes, dtype=edge_index.dtype)
    row = jnp.concatenate([row, loop])
    col = jnp.concatenate([col, loop])
    ew = jnp.ones(row.shape[0], dtype=dtype)
    deg = jnp.zeros((num_nodes,), dtype=dtype).at[row].add(ew)
    deg_inv_sqrt = jnp.where(deg > 0, deg ** -0.5, 0.0)
    norm = deg_inv_sqrt[row] * ew * deg_inv_sqrt[col]
    # out[i] = sum_{edges (j -> i)} norm_e * x[j]   =>   S[i, j] += norm_e
    S = jnp.zeros((num_nodes, num_nodes), dtype=dtype).at[col, row].add(norm)
    return S


# ---------------------------------------------------------------------------
# General path: one hop  H_{k+1} = S @ H_k  per pallas_call.
# ---------------------------------------------------------------------------
def _spmm_hop_kernel(TJ, s_ref, h_ref, o_ref, acc_ref):
    """grid = (n_i, n_j)  — row blocks "parallel", contraction "arbitrary".

    s_ref  : (T, TJ)             bf16  S[i-block, j-block]   (streamed)
    h_ref  : (N_pad, F_out_pad)  bf16  full H_k, VMEM-resident (read once)
    o_ref  : (T, F_out_pad)            output row block       (streamed)
    acc_ref: (T, F_out_pad)      f32   per-row-block accumulator
    """
    j = pl.program_id(1)
    n_j = pl.num_programs(1)

    @pl.when(j == 0)
    def _():
        acc_ref[...] = jnp.zeros_like(acc_ref)

    j0 = pl.multiple_of(j * TJ, TJ)
    acc_ref[...] += jnp.dot(s_ref[...], h_ref[pl.ds(j0, TJ), :],
                            preferred_element_type=jnp.float32)

    @pl.when(j == n_j - 1)
    def _():
        o_ref[...] = acc_ref[...].astype(o_ref.dtype)


def _spmm_hop(S_pad, h, T, TJ, hop_dtype, vmem_cap):
    N_pad = S_pad.shape[0]
    F_out_pad = h.shape[1]
    n_i = N_pad // T
    n_j = N_pad // TJ
    out_bytes = jnp.dtype(hop_dtype).itemsize

    flops = 2 * N_pad * N_pad * F_out_pad
    bytes_accessed = (N_pad * N_pad * 2 + N_pad * F_out_pad * 2
                      + N_pad * F_out_pad * out_bytes)

    vmem_need = (2 * T * TJ * 2                      # double-buffered S tile
                 + 2 * N_pad * F_out_pad * 2         # resident H_k (+ spare buf)
                 + 2 * T * F_out_pad * out_bytes     # double-buffered out block
                 + T * F_out_pad * 4)                # accumulator
    vmem_limit = int(min(vmem_cap, max(32 * 1024 * 1024, 2 * vmem_need)))

    return pl.pallas_call(
        functools.partial(_spmm_hop_kernel, TJ),
        out_shape=jax.ShapeDtypeStruct((N_pad, F_out_pad), hop_dtype),
        grid_spec=pltpu.PrefetchScalarGridSpec(
            num_scalar_prefetch=0,
            grid=(n_i, n_j),
            in_specs=[
                pl.BlockSpec((T, TJ), lambda i, j: (i, j)),              # S tile
                pl.BlockSpec((N_pad, F_out_pad), lambda i, j: (0, 0)),   # H_k
            ],
            out_specs=pl.BlockSpec((T, F_out_pad), lambda i, j: (i, 0)),
            scratch_shapes=[pltpu.VMEM((T, F_out_pad), jnp.float32)],
        ),
        compiler_params=pltpu.CompilerParams(
            # Row blocks independent -> "parallel" (lets v7x use both cores);
            # contraction is the resident-accumulator reduction -> "arbitrary".
            dimension_semantics=("parallel", "arbitrary"),
            vmem_limit_bytes=vmem_limit,
        ),
        cost_estimate=pl.CostEstimate(flops=int(flops), transcendentals=0,
                                      bytes_accessed=int(bytes_accessed)),
    )(S_pad, h)


# ---------------------------------------------------------------------------
# Fused path: S VMEM-resident, all K hops in a single kernel invocation.
# ---------------------------------------------------------------------------
def _sgc_fused_kernel(K, s_ref, h_ref, o_ref):
    s = s_ref[...]
    h = h_ref[...]
    out = None
    for _ in range(K):                      # K is a small Python int -> unrolled
        out = jnp.dot(s, h, preferred_element_type=jnp.float32)
        h = out.astype(jnp.bfloat16)        # inter-hop hand-off in bf16
    o_ref[...] = out.astype(o_ref.dtype)


def _sgc_fused(S_pad, h0, K, out_dtype, vmem_limit):
    N_pad = S_pad.shape[0]
    F_out_pad = h0.shape[1]
    out_bytes = jnp.dtype(out_dtype).itemsize
    flops = 2 * K * N_pad * N_pad * F_out_pad
    bytes_accessed = (N_pad * N_pad * 2 + N_pad * F_out_pad * 2
                      + N_pad * F_out_pad * out_bytes)

    # TODO(synk): the fused path runs on a single TensorCore (one grid step);
    # on v7x the general path already exposes row-block parallelism instead.
    return pl.pallas_call(
        functools.partial(_sgc_fused_kernel, K),
        out_shape=jax.ShapeDtypeStruct((N_pad, F_out_pad), out_dtype),
        grid_spec=pltpu.PrefetchScalarGridSpec(
            num_scalar_prefetch=0,
            grid=(1,),
            in_specs=[
                pl.BlockSpec((N_pad, N_pad), lambda i: (0, 0)),          # S
                pl.BlockSpec((N_pad, F_out_pad), lambda i: (0, 0)),      # H0
            ],
            out_specs=pl.BlockSpec((N_pad, F_out_pad), lambda i: (0, 0)),
        ),
        compiler_params=pltpu.CompilerParams(
            dimension_semantics=("arbitrary",),
            vmem_limit_bytes=vmem_limit,
        ),
        cost_estimate=pl.CostEstimate(flops=int(flops), transcendentals=0,
                                      bytes_accessed=int(bytes_accessed)),
    )(S_pad, h0)


# ---------------------------------------------------------------------------
# Public forward.
# ---------------------------------------------------------------------------
def sgc_encoder_forward(x, edge_index, W, b, K, *, row_tile=None,
                        max_contract_tile=2048, force_general=False):
    """x: [N, F_in], edge_index: [2, E], W: [F_out, F_in], b: [F_out]."""
    assert K >= 1
    N, F_in = x.shape
    F_out = W.shape[0]
    out_dtype = x.dtype
    out_bytes = jnp.dtype(out_dtype).itemsize

    # Tiling: row tile T, wide contraction tile TJ (amortizes per-step cost).
    T = row_tile if row_tile is not None else (128 if N <= 128 else 256)
    N_pad = _round_up(max(N, T), T)
    TJ = min(N_pad, max_contract_tile)
    while N_pad % TJ != 0:                  # TJ must evenly divide N_pad
        TJ -= T                             # stays a multiple of 128
    F_out_pad = _round_up(F_out, 128)

    # Dense normalized adjacency, zero-padded, bf16 (MXU-native).
    S = build_norm_adj(edge_index, N, dtype=jnp.float32)
    S_pad = jnp.zeros((N_pad, N_pad), jnp.bfloat16).at[:N, :N].set(
        S.astype(jnp.bfloat16))

    # H0 = X @ W^T + b in plain XLA (tiny vs. K*N^2*F_out flops).
    # Padded rows of H0 are exactly zero (no bias bleed into padding).
    h0 = x.astype(jnp.float32) @ W.astype(jnp.float32).T + b.astype(jnp.float32)
    h0_pad = jnp.zeros((N_pad, F_out_pad), jnp.bfloat16).at[:N, :F_out].set(
        h0.astype(jnp.bfloat16))

    vmem_cap = _vmem_soft_cap()

    # Fused path: keep S fully VMEM-resident and run all K hops in one
    # invocation when the whole working set fits comfortably in the budget
    # (cuts S HBM reads by K and removes K-1 grid sweeps of fixed overhead).
    fused_need = (2 * N_pad * N_pad * 2              # S (pipeliner buffers)
                  + 2 * N_pad * F_out_pad * 2        # H0
                  + 2 * N_pad * F_out_pad * out_bytes
                  + 4 * N_pad * F_out_pad * 4)       # hop intermediates (f32)
    use_fused = (not force_general) and fused_need <= (vmem_cap * 3) // 4

    if use_fused:
        vmem_limit = int(min(vmem_cap, max(32 * 1024 * 1024, 2 * fused_need)))
        out_pad = _sgc_fused(S_pad, h0_pad, K, out_dtype, vmem_limit)
    else:
        h = h0_pad
        for k in range(K):
            hop_dtype = out_dtype if k == K - 1 else jnp.bfloat16
            h = _spmm_hop(S_pad, h, T, TJ, hop_dtype, vmem_cap)
        out_pad = h

    return out_pad[:N, :F_out]


if __name__ == "__main__":
    # Module config: SGCEncoder(in_features=8, hidden_dims=[32, 32]) -> K=2.
    N = 16          # number of graph nodes
    F_IN = 8
    HIDDEN_DIMS = [32, 32]
    F_OUT = HIDDEN_DIMS[-1]
    K = len(HIDDEN_DIMS)

    key = jax.random.PRNGKey(0)
    kx, kw, kb = jax.random.split(key, 3)

    # Node features.
    x = jax.random.normal(kx, (N, F_IN), dtype=jnp.float32)

    # Deterministic nn.Linear-style init: U(-1/sqrt(F_in), 1/sqrt(F_in)).
    bound = 1.0 / (F_IN ** 0.5)
    W = jax.random.uniform(kw, (F_OUT, F_IN), minval=-bound, maxval=bound,
                           dtype=jnp.float32)
    b = jax.random.uniform(kb, (F_OUT,), minval=-bound, maxval=bound,
                           dtype=jnp.float32)

    # Small deterministic graph (ring both ways + a few chords), no self loops.
    src = jnp.concatenate([
        jnp.arange(N),
        (jnp.arange(N) + 1) % N,
        jnp.array([0, 3, 7, 11]),
    ]).astype(jnp.int32)
    dst = jnp.concatenate([
        (jnp.arange(N) + 1) % N,
        jnp.arange(N),
        jnp.array([8, 12, 2, 5]),
    ]).astype(jnp.int32)
    edge_index = jnp.stack([src, dst], axis=0)   # [2, E]

    # Pure-JAX reference with the same bf16 rounding of S and the inter-hop H.
    S_ref = build_norm_adj(edge_index, N, dtype=jnp.float32)
    Sb = S_ref.astype(jnp.bfloat16).astype(jnp.float32)
    h_ref = x @ W.T + b
    for _ in range(K):
        h_ref = Sb @ h_ref.astype(jnp.bfloat16).astype(jnp.float32)

    # 1) Default path (fused: S kept VMEM-resident for this small graph).
    out_fused = jax.block_until_ready(
        sgc_encoder_forward(x, edge_index, W, b, K))
    # 2) General streaming path (tiled S, per-hop pallas_call) — also checked.
    out_general = jax.block_until_ready(
        sgc_encoder_forward(x, edge_index, W, b, K, force_general=True))

    for out in (out_fused, out_general):
        assert out.shape == (N, F_OUT)
        assert jnp.allclose(out, h_ref, atol=1e-2, rtol=1e-2), (
            float(jnp.max(jnp.abs(out - h_ref))))

    print("KERNEL_OK")
</pallas_src>

<mosaic_0001>
module attributes {stable_mosaic.version = 11 : i64} {
  func.func @_sgc_fused_kernel(%arg0: i32, %arg1: memref<128x128xbf16, #tpu.memory_space<vmem>>, %arg2: memref<128x128xbf16, #tpu.memory_space<vmem>>, %arg3: memref<128x128xf32, #tpu.memory_space<vmem>>) attributes {dimension_semantics = [#tpu.dimension_semantics<arbitrary>], iteration_bounds = array<i64: 1>, scalar_prefetch = 0 : i64, scratch_operands = 0 : i64, tpu.core_type = #tpu.core_type<tc>, window_params = [{pipeline_mode = #tpu.pipeline_mode<synchronous>, transform_indices = @transform_0, window_bounds = array<i64: 128, 128>}, {pipeline_mode = #tpu.pipeline_mode<synchronous>, transform_indices = @transform_1, window_bounds = array<i64: 128, 128>}, {pipeline_mode = #tpu.pipeline_mode<synchronous>, transform_indices = @transform_2, window_bounds = array<i64: 128, 128>}]} {
    %c0 = arith.constant 0 : index
    %c0_0 = arith.constant 0 : index
    %0 = vector.load %arg1[%c0, %c0_0] : memref<128x128xbf16, #tpu.memory_space<vmem>>, vector<128x128xbf16>
    %c0_1 = arith.constant 0 : index
    %c0_2 = arith.constant 0 : index
    %1 = vector.load %arg2[%c0_1, %c0_2] : memref<128x128xbf16, #tpu.memory_space<vmem>>, vector<128x128xbf16>
    %cst = arith.constant dense<0.000000e+00> : vector<128x128xf32>
    %2 = tpu.matmul %0, %1, %cst {dimension_numbers = #tpu.dot_dimension_numbers<[1], [0], [0], [1], [0, 0, 1, 1], [], []>} : vector<128x128xbf16>, vector<128x128xbf16>, vector<128x128xf32> -> vector<128x128xf32>
    %3 = arith.truncf %2 : vector<128x128xf32> to vector<128x128xbf16>
    %cst_3 = arith.constant dense<0.000000e+00> : vector<128x128xf32>
    %4 = tpu.matmul %0, %3, %cst_3 {dimension_numbers = #tpu.dot_dimension_numbers<[1], [0], [0], [1], [0, 0, 1, 1], [], []>} : vector<128x128xbf16>, vector<128x128xbf16>, vector<128x128xf32> -> vector<128x128xf32>
    %c0_4 = arith.constant 0 : index
    %c0_5 = arith.constant 0 : index
    %5 = vector.load %arg3[%c0_4, %c0_5] : memref<128x128xf32, #tpu.memory_space<vmem>>, vector<128x128xf32>
    tpu.vector_store %arg3[%c0_4, %c0_5], %4 {strides = array<i32>} : memref<128x128xf32, #tpu.memory_space<vmem>>, vector<128x128xf32>,
    return
  }
  func.func @transform_0(%arg0: i32) -> (i32, i32) {
    %c0_i32 = arith.constant 0 : i32
    %c0_i32_0 = arith.constant 0 : i32
    %c0_i32_1 = arith.constant 0 : i32
    return %c0_i32, %c0_i32_0 : i32, i32
  }
  func.func @transform_1(%arg0: i32) -> (i32, i32) {
    %c0_i32 = arith.constant 0 : i32
    %c0_i32_0 = arith.constant 0 : i32
    %c0_i32_1 = arith.constant 0 : i32
    return %c0_i32, %c0_i32_0 : i32, i32
  }
  func.func @transform_2(%arg0: i32) -> (i32, i32) {
    %c0_i32 = arith.constant 0 : i32
    %c0_i32_0 = arith.constant 0 : i32
    %c0_i32_1 = arith.constant 0 : i32
    return %c0_i32, %c0_i32_0 : i32, i32
  }
}

</mosaic_0001>

<bundles_post_ra>
// kernel: tpu_custom_call.1
= control target key start
LH: loop header
LB: loop body
LE: loop exit
PB: predicated region body
PF: predicated region fallthrough
CT: control target
= control target key end

     0   :  { %7 = vsyncpa [#allocation3], 0  ;;  %s637_s0 = inlined_call_operand.hbm [shape: bf16[128,128], index: 0, kind: input, shape index: {}]   ;;  %s638_s1 = inlined_call_operand.hbm [shape: bf16[128,128], index: 1, kind: input, shape index: {}]   ;;  %s639_s2 = inlined_call_operand.hbm [shape: f32[128,128], index: 2, kind: output, shape index: {}]  }
   0x1   :  { %8 = vsyncpa [#allocation6], 0 }
   0x2   :  { %9 = vsyncpa [#allocation4], 0  ;;  %s606_s9 = smov [#allocation2]  }
   0x3   :  { %s15_s10 = sshll.u32 %s606_s9, 4  ;;  %s16_s10 = int_to_ptr.vmem [resolvable:$true] %s15_s10 }
   0x4   :  { %s548_s11 = scalar_lea.vmem %s16_s10, 1024  ;;  %p553_p1 = scmp.lt.s32.totalorder %s16_s10, %s16_s10 }
   0x5   :  { %p549_p0 = scmp.ne.s32.totalorder %s16_s10, %s548_s11  ;;  %p554_p2 = scmp.lt.s32.totalorder %s548_s11, %s548_s11 }
   0x7   :  { %p555_p3 = por %p554_p2, %p553_p1 }
   0x9   :  { %p556_p4 = pnand %p555_p3, %p549_p0 }
   0xb   :  { %559 = shalt.err (!%p556_p4)
}
   0xc   :  { %s607_s12 = smov 64   ;;  %s608_s13 = smov 4  }
   0xd   :  { %21 = dma.hbm_to_vmem [thread:$0]  %s637_s0, 1024, %s16_s10, [#allocation3], %s607_s12, %s607_s12, %s608_s13  }
   0xe   :  { %s609_s16 = smov [#allocation5]  }
   0xf   :  { %s27_s17 = sshll.u32 %s609_s16, 4  ;;  %s28_s17 = int_to_ptr.vmem [resolvable:$true] %s27_s17 }
  0x10   :  { %s568_s18 = scalar_lea.vmem %s28_s17, 1024  ;;  %p573_p6 = scmp.lt.s32.totalorder %s28_s17, %s28_s17 }
  0x11   :  { %p569_p5 = scmp.ne.s32.totalorder %s28_s17, %s568_s18  ;;  %p574_p7 = scmp.lt.s32.totalorder %s568_s18, %s568_s18 }
  0x13   :  { %p575_p8 = por %p574_p7, %p573_p6 }
  0x15   :  { %p576_p9 = pnand %p575_p8, %p569_p5 }
  0x17   :  { %579 = shalt.err (!%p576_p9)
}
  0x18   :  { %33 = dma.hbm_to_vmem [thread:$0]  %s638_s1, 1024, %s28_s17, [#allocation6], %s607_s12, %s607_s12, %s608_s13  }
  0x19   :  { %600 = dma.done.wait [#allocation3], 1024  }
  0x1a   :  { %601 = vsyncadd [#allocation3], 4294966272 }
  0x1b   :  { %602 = dma.done.wait [#allocation6], 1024  }
  0x1c   :  { %603 = vsyncadd [#allocation6], 4294966272  ;;  %v524_v0 = vld [vmem:[#allocation5 + $0x38] sm:$0xff]   ;;  %v525_v1 = vld [vmem:[#allocation5 + $0x30] sm:$0xff]   ;;  %s610_s0 = smov [#allocation7]  }
  0x1d   :  { %453 = vmatprep.subr.bf16.mxu0 %v524_v0  ;;  %v526_v2 = vld [vmem:[#allocation5 + $0x28] sm:$0xff]   ;;  %v527_v3 = vld [vmem:[#allocation5 + $0x20] sm:$0xff]   ;;  %v528_v5 = vld [vmem:[#allocation5 + $0x18] sm:$0xff]   ;;  %s392_s1 = sshll.u32 %s610_s0, 4  ;;  %s393_s1 = int_to_ptr.vmem [resolvable:$true] %s392_s1 }
  0x1e   :  { %454 = vmatpush3.bf16.msra.mxu0 %v524_v0  ;;  %v532_v4 = vld [vmem:[#allocation2] sm:$0xff]   ;;  %v529_v6 = vld [vmem:[#allocation5 + $0x10] sm:$0xff]   ;;  %v530_v7 = vld [vmem:[#allocation5 + $0x8] sm:$0xff]   ;;  %s580_s21 = scalar_lea.vmem %s393_s1, 2048  ;;  %p585_p11 = scmp.lt.s32.totalorder %s393_s1, %s393_s1 }
  0x1f   :  { %455 = vmatprep.subr.bf16.mxu0 %v525_v1  ;;  %469 = vmatprep.mubr.bf16.mxu0 %v532_v4  ;;  %v531_v8 = vld [vmem:[#allocation5] sm:$0xff]   ;;  %v533_v9 = vld [vmem:[#allocation2 + $0x8] sm:$0xff]   ;;  %v534_v10 = vld [vmem:[#allocation2 + $0x10] sm:$0xff]   ;;  %p581_p10 = scmp.ne.s32.totalorder %s393_s1, %s580_s21  ;;  %p586_p12 = scmp.lt.s32.totalorder %s580_s21, %s580_s21 }
  0x20   :  { %501 = vmatprep.mubr.bf16.mxu1 %v532_v4  ;;  %v535_v11 = vld [vmem:[#allocation2 + $0x18] sm:$0xff]   ;;  %v536_v12 = vld [vmem:[#allocation2 + $0x20] sm:$0xff]   ;;  %v537_v13 = vld [vmem:[#allocation2 + $0x28] sm:$0xff]  }
  0x21   :  { %v538_v14 = vld [vmem:[#allocation2 + $0x30] sm:$0xff]   ;;  %v539_v15 = vld [vmem:[#allocation2 + $0x38] sm:$0xff]   ;;  %p587_p13 = por %p586_p12, %p585_p11 }
  0x22   :  { %456 = vmatpush3.bf16.msra.mxu0 %v525_v1 }
  0x23   :  { %457 = vmatprep.subr.bf16.mxu0 %v526_v2  ;;  %p588_p0 = pnand %p587_p13, %p581_p10 }
  0x26   :  { %458 = vmatpush3.bf16.msra.mxu0 %v526_v2 }
  0x27   :  { %459 = vmatprep.subr.bf16.mxu0 %v527_v3 }
  0x2a   :  { %460 = vmatpush3.bf16.msra.mxu0 %v527_v3 }
  0x2b   :  { %461 = vmatprep.subr.bf16.mxu0 %v528_v5 }
  0x2e   :  { %462 = vmatpush3.bf16.msra.mxu0 %v528_v5 }
  0x2f   :  { %463 = vmatprep.subr.bf16.mxu0 %v529_v6 }
  0x32   :  { %464 = vmatpush3.bf16.msra.mxu0 %v529_v6 }
  0x33   :  { %465 = vmatprep.subr.bf16.mxu0 %v530_v7 }
  0x36   :  { %466 = vmatpush3.bf16.msra.mxu0 %v530_v7 }
  0x37   :  { %467 = vmatprep.subr.bf16.mxu0 %v531_v8 }
  0x3a   :  { %468 = vmatpush3.bf16.msra.mxu0 %v531_v8 }
  0x3d   :  { %470 = vmatmul.mubr.bf16.vlgmr.msra.gmra.mxu0 %v533_v9 }
  0x3e   :  { %473 = vmatprep.mubr.bf16.mxu0 %v534_v10 }
  0x45   :  { %474 = vmatmul.mubr.bf16.gmra.mxu0 %v535_v11 }
  0x46   :  { %477 = vmatprep.mubr.bf16.mxu0 %v536_v12 }
  0x4d   :  { %478 = vmatmul.mubr.bf16.gmra.mxu0 %v537_v13 }
  0x4e   :  { %481 = vmatprep.mubr.bf16.mxu0 %v538_v14 }
  0x55   :  { %482 = vmatmul.mubr.bf16.gmra.mxu0 %v539_v15 }
  0xfd   :  { %v471_v16 = vpop.f32.mrf.mxu0 }
  0xff   :  { %v203_v17 = vpop.f32.mrf.mxu0 }
 0x101   :  { %v472_v18 = vpop.f32.mrf.mxu0 }
 0x102   :  { %v267_v38 = vpack.c.bf16 %v472_v18, %v471_v16 }
 0x103   :  { %v206_v19 = vpop.f32.mrf.mxu0 }
 0x104   :  { %v266_v39 = vpack.c.bf16 %v206_v19, %v203_v17 }
 0x105   :  { %v475_v20 = vpop.f32.mrf.mxu0 }
 0x107   :  { %v219_v21 = vpop.f32.mrf.mxu0 }
 0x109   :  { %v476_v22 = vpop.f32.mrf.mxu0 }
 0x10a   :  { %v269_v36 = vpack.c.bf16 %v476_v22, %v475_v20 }
 0x10b   :  { %v222_v23 = vpop.f32.mrf.mxu0 }
 0x10c   :  { %v268_v37 = vpack.c.bf16 %v222_v23, %v219_v21 }
 0x10d   :  { %v479_v24 = vpop.f32.mrf.mxu0 }
 0x10f   :  { %v235_v25 = vpop.f32.mrf.mxu0 }
 0x111   :  { %v480_v26 = vpop.f32.mrf.mxu0 }
 0x112   :  { %v271_v34 = vpack.c.bf16 %v480_v26, %v479_v24 }
 0x113   :  { %v238_v27 = vpop.f32.mrf.mxu0 }
 0x114   :  { %v270_v35 = vpack.c.bf16 %v238_v27, %v235_v25 }
 0x115   :  { %v483_v28 = vpop.f32.mrf.mxu0 }
 0x117   :  { %v251_v29 = vpop.f32.mrf.mxu0 }
 0x119   :  { %v484_v30 = vpop.f32.mrf.mxu0 }
 0x11a   :  { %v273_v31 = vpack.c.bf16 %v484_v30, %v483_v28 }
 0x11b   :  { %v254_v32 = vpop.f32.mrf.mxu0 }
 0x11c   :  { %v272_v33 = vpack.c.bf16 %v254_v32, %v251_v29  ;;  %485 = vmatprep.subr.bf16.mxu1 %v273_v31 }
 0x11d   :  { %486 = vmatpush3.bf16.msra.mxu1 %v273_v31 }
 0x11e   :  { %487 = vmatprep.subr.bf16.mxu1 %v272_v33 }
 0x121   :  { %488 = vmatpush3.bf16.msra.mxu1 %v272_v33 }
 0x122   :  { %489 = vmatprep.subr.bf16.mxu1 %v271_v34 }
 0x125   :  { %490 = vmatpush3.bf16.msra.mxu1 %v271_v34 }
 0x126   :  { %491 = vmatprep.subr.bf16.mxu1 %v270_v35 }
 0x129   :  { %492 = vmatpush3.bf16.msra.mxu1 %v270_v35 }
 0x12a   :  { %493 = vmatprep.subr.bf16.mxu1 %v269_v36 }
 0x12d   :  { %494 = vmatpush3.bf16.msra.mxu1 %v269_v36 }
 0x12e   :  { %495 = vmatprep.subr.bf16.mxu1 %v268_v37 }
 0x131   :  { %496 = vmatpush3.bf16.msra.mxu1 %v268_v37 }
 0x132   :  { %497 = vmatprep.subr.bf16.mxu1 %v267_v38 }
 0x135   :  { %498 = vmatpush3.bf16.msra.mxu1 %v267_v38 }
 0x136   :  { %499 = vmatprep.subr.bf16.mxu1 %v266_v39 }
 0x139   :  { %500 = vmatpush3.bf16.msra.mxu1 %v266_v39 }
 0x13c   :  { %502 = vmatmul.mubr.bf16.vlgmr.msra.gmra.mxu1 %v533_v9 }
 0x13d   :  { %505 = vmatprep.mubr.bf16.mxu1 %v534_v10 }
 0x144   :  { %506 = vmatmul.mubr.bf16.gmra.mxu1 %v535_v11 }
 0x145   :  { %509 = vmatprep.mubr.bf16.mxu1 %v536_v12 }
 0x14c   :  { %510 = vmatmul.mubr.bf16.gmra.mxu1 %v537_v13 }
 0x14d   :  { %513 = vmatprep.mubr.bf16.mxu1 %v538_v14 }
 0x154   :  { %514 = vmatmul.mubr.bf16.gmra.mxu1 %v539_v15 }
 0x1fc   :  { %v503_v40 = vpop.f32.mrf.mxu1 }
 0x1fd   :  { %373 = vst [vmem:[#allocation7 + $0x10] sm:$0xff] %v503_v40 }
 0x1fe   :  { %v308_v41 = vpop.f32.mrf.mxu1 }
 0x1ff   :  { %371 = vst [vmem:[#allocation7] sm:$0xff] %v308_v41 }
 0x200   :  { %v504_v42 = vpop.f32.mrf.mxu1 }
 0x201   :  { %374 = vst [vmem:[#allocation7 + $0x18] sm:$0xff] %v504_v42 }
 0x202   :  { %v311_v43 = vpop.f32.mrf.mxu1 }
 0x203   :  { %372 = vst [vmem:[#allocation7 + $0x8] sm:$0xff] %v311_v43 }
 0x204   :  { %v507_v44 = vpop.f32.mrf.mxu1 }
 0x205   :  { %377 = vst [vmem:[#allocation7 + $0x30] sm:$0xff] %v507_v44 }
 0x206   :  { %v324_v45 = vpop.f32.mrf.mxu1 }
 0x207   :  { %375 = vst [vmem:[#allocation7 + $0x20] sm:$0xff] %v324_v45 }
 0x208   :  { %v508_v46 = vpop.f32.mrf.mxu1 }
 0x209   :  { %378 = vst [vmem:[#allocation7 + $0x38] sm:$0xff] %v508_v46 }
 0x20a   :  { %v327_v47 = vpop.f32.mrf.mxu1 }
 0x20b   :  { %376 = vst [vmem:[#allocation7 + $0x28] sm:$0xff] %v327_v47 }
 0x20c   :  { %v511_v48 = vpop.f32.mrf.mxu1 }
 0x20d   :  { %381 = vst [vmem:[#allocation7 + $0x50] sm:$0xff] %v511_v48 }
 0x20e   :  { %v340_v49 = vpop.f32.mrf.mxu1 }
 0x20f   :  { %379 = vst [vmem:[#allocation7 + $0x40] sm:$0xff] %v340_v49 }
 0x210   :  { %v512_v50 = vpop.f32.mrf.mxu1 }
 0x211   :  { %382 = vst [vmem:[#allocation7 + $0x58] sm:$0xff] %v512_v50 }
 0x212   :  { %v343_v51 = vpop.f32.mrf.mxu1 }
 0x213   :  { %380 = vst [vmem:[#allocation7 + $0x48] sm:$0xff] %v343_v51 }
 0x214   :  { %v515_v52 = vpop.f32.mrf.mxu1 }
 0x215   :  { %385 = vst [vmem:[#allocation7 + $0x70] sm:$0xff] %v515_v52 }
 0x216   :  { %v356_v53 = vpop.f32.mrf.mxu1 }
 0x217   :  { %383 = vst [vmem:[#allocation7 + $0x60] sm:$0xff] %v356_v53 }
 0x218   :  { %v516_v54 = vpop.f32.mrf.mxu1 }
 0x219   :  { %386 = vst [vmem:[#allocation7 + $0x78] sm:$0xff] %v516_v54 }
 0x21a   :  { %v359_v55 = vpop.f32.mrf.mxu1 }
 0x21b   :  { %384 = vst [vmem:[#allocation7 + $0x68] sm:$0xff] %v359_v55 }
 0x21c   :  { %591 = shalt.err (!%p588_p0)
}
 0x21d   :  { %s611_s22 = smov 128   ;;  %s612_s23 = smov 8  }
 0x21e   :  { %398 = dma.vmem_to_hbm [thread:$0]  %s393_s1, 2048, %s639_s2, [#allocation4], %s611_s22, %s611_s22, %s612_s23  }
 0x21f   :  { %604 = dma.done.wait [#allocation4], 2048  }
 0x220   :  { %605 = vsyncadd [#allocation4], 4294965248 }
 0x221   :  { %402 = vsyncpa [#allocation3], 1 }
 0x222   :  { %403 = vsyncpa [#allocation6], 1 }
 0x223   :  { %404 = vsyncpa [#allocation4], 1 }

</bundles_post_ra>
